<compile_context>
chip_gen: v7x
topology: tpu7x:2x2x1
jax: 0.10.0
libtpu: 0.0.40
codegen_flags: <defaults>
</compile_context>

<pallas_src>
import jax
import jax.numpy as jnp
from jax.experimental import pallas as pl
from jax.experimental.pallas import tpu as pltpu


def _round_up(n, m):
    return ((n + m - 1) // m) * m


def _leaky_relu(x, slope=0.2):
    # max(x, 0.2*x) == LeakyReLU(0.2): one VPU op instead of cmp+mul+select.
    return jnp.maximum(x, slope * x)


def discriminator_mlp_kernel(x_ref,
                             w1_ref, b1_ref,
                             w2_ref, b2_ref,
                             w3_ref, b3_ref,
                             w4_ref, b4_ref,
                             o_ref):
    # x_ref:  (TB, K) f32 (cast to bf16 here, not in the wrapper)
    # w1/w2/w3: bf16 (in, out)    b1/b2/b3: (1, out) f32
    # w4_ref: (1, H) f32          b4_ref: (1, 1) f32 in SMEM
    # o_ref:  (TB, 1) f32

    x = x_ref[...].astype(jnp.bfloat16)          # VPU cast, hidden under DMA/MXU

    # ---- Linear(32*32*C -> 4H) + LeakyReLU(0.2) ----  (MXU bf16, f32 acc)
    h = jnp.dot(x, w1_ref[...],
                preferred_element_type=jnp.float32) + b1_ref[...]
    h = _leaky_relu(h)

    # ---- Linear(4H -> 2H) + LeakyReLU(0.2) ----
    h = jnp.dot(h.astype(jnp.bfloat16), w2_ref[...],
                preferred_element_type=jnp.float32) + b2_ref[...]
    h = _leaky_relu(h)

    # ---- Linear(2H -> H) + LeakyReLU(0.2) ----
    h = jnp.dot(h.astype(jnp.bfloat16), w3_ref[...],
                preferred_element_type=jnp.float32) + b3_ref[...]
    h = _leaky_relu(h)                                   # (TB, H) f32

    # ---- Linear(H -> 1) + Sigmoid ----
    # N=1 projection on the VPU (broadcast mul) + XLU lane reduce; avoids a
    # nearly-empty MXU pass. Bias is a scalar read from SMEM.
    logits = jnp.sum(h * w4_ref[...], axis=-1, keepdims=True) + b4_ref[0, 0]

    # Numerically stable sigmoid: exp(-|l|) never overflows; divide goes to
    # the EUP via approx reciprocal (separate bundle slot).
    z = jnp.exp(-jnp.abs(logits))
    num = jnp.where(logits >= 0, 1.0, z)
    o_ref[...] = num * pl.reciprocal(1.0 + z, approx=True)


def _vmem_limit_bytes(tb, K, params):
    """Budget scoped VMEM from the actual pipeline buffers (+ headroom)."""
    nbytes = lambda a: a.size * a.dtype.itemsize
    (w1, b1), (w2, b2), (w3, b3), (w4t, _b4) = params
    x_tile = tb * K * 4                      # f32 x tile
    out_tile = tb * 4                        # (tb, 1) f32 output tile
    resident = sum(nbytes(a) for a in (w1, b1, w2, b2, w3, b3, w4t))
    h4 = tb * w1.shape[1] * 4                # largest f32 intermediate (tb, 4H)
    # x/out tiles and resident blocks are double-buffered by the pipeline
    # (default Buffered(2)); add headroom for intermediates / register spills.
    budget = 2 * (x_tile + out_tile + resident) + 4 * h4 + (8 << 20)
    return min(budget, 60 * 1024 * 1024)     # stay under v7x's 64 MiB physical


def discriminator_mlp_forward(x, params, *, tb=256):
    """x: (B, C, 32, 32) float32, NCHW. Returns (B,) float32 probabilities."""
    B = x.shape[0]
    (w1, b1), (w2, b2), (w3, b3), (w4t, b4) = params
    K = w1.shape[0]

    # torch x.view(B, -1); stays f32 — no wrapper cast, no pad (edge blocks).
    x_flat = x.reshape(B, -1)
    assert x_flat.shape[1] == K, (x_flat.shape, K)

    # Clamp the batch tile for tiny batches; keep it a multiple of 8.
    tb = max(8, min(_round_up(tb, 8), _round_up(B, 8)))
    nb = pl.cdiv(B, tb)

    resident = lambda shape: pl.BlockSpec(shape, lambda i: (0, 0))

    out = pl.pallas_call(
        discriminator_mlp_kernel,
        out_shape=jax.ShapeDtypeStruct((B, 1), jnp.float32),
        grid=(nb,),
        in_specs=[
            pl.BlockSpec((tb, K), lambda i: (i, 0)),               # x (batched)
            resident(w1.shape), resident(b1.shape),                # layer 1
            resident(w2.shape), resident(b2.shape),                # layer 2
            resident(w3.shape), resident(b3.shape),                # layer 3
            resident(w4t.shape),                                   # (1, H) f32
            pl.BlockSpec(memory_space=pltpu.MemorySpace.SMEM),     # b4 scalar
        ],
        out_specs=pl.BlockSpec((tb, 1), lambda i: (i, 0)),         # (TB,1) column
        compiler_params=pltpu.CompilerParams(
            dimension_semantics=("parallel",),          # shard batch over TCs
            vmem_limit_bytes=_vmem_limit_bytes(tb, K, params),
        ),
    )(x_flat, w1, b1, w2, b2, w3, b3, w4t, b4)

    # torch: .view(-1, 1).squeeze(1) -> (B,)  (contiguous view, no strided slice)
    return out.reshape(-1)


def init_params(key, num_channels, hidden_dim):
    """Deterministic init mimicking PyTorch's default Linear init:
    U(-1/sqrt(fan_in), 1/sqrt(fan_in)) for weight and bias.
    Layers 1-3: weight (in, out) bf16, bias (1, out) f32.
    Layer 4:    weight stored transposed as (1, H) f32, bias (1, 1) f32."""
    dims = [32 * 32 * num_channels,
            hidden_dim * 4,
            hidden_dim * 2,
            hidden_dim,
            1]
    params = []
    for i in range(4):
        key, kw, kb = jax.random.split(key, 3)
        fan_in, fan_out = dims[i], dims[i + 1]
        bound = 1.0 / jnp.sqrt(fan_in)
        w = jax.random.uniform(kw, (fan_in, fan_out), jnp.float32,
                               minval=-bound, maxval=bound)
        b = jax.random.uniform(kb, (1, fan_out), jnp.float32,
                               minval=-bound, maxval=bound)
        if i < 3:
            params.append((w.astype(jnp.bfloat16), b))
        else:
            params.append((w.T, b))          # (1, H) f32 for the VPU path
    return params


def reference_forward(x, params):
    """Pure-JAX reference mirroring the kernel's bf16 matmul inputs."""
    (w1, b1), (w2, b2), (w3, b3), (w4t, b4) = params
    f32 = jnp.float32

    def lrelu(v):
        return jnp.maximum(v, 0.2 * v)

    h = x.reshape(x.shape[0], -1).astype(jnp.bfloat16).astype(f32)
    h = lrelu(h @ w1.astype(f32) + b1)
    h = lrelu(h.astype(jnp.bfloat16).astype(f32) @ w2.astype(f32) + b2)
    h = lrelu(h.astype(jnp.bfloat16).astype(f32) @ w3.astype(f32) + b3)
    logits = jnp.sum(h * w4t, axis=-1, keepdims=True) + b4
    return jax.nn.sigmoid(logits).reshape(-1)


if __name__ == "__main__":
    num_channels = 1    # input must be (B, C, 32, 32) because of the 32*32*C flatten
    hidden_dim = 32
    batch = 2

    key = jax.random.PRNGKey(0)
    key, kx = jax.random.split(key)
    x = jax.random.normal(kx, (batch, num_channels, 32, 32), dtype=jnp.float32)
    params = init_params(key, num_channels, hidden_dim)

    out = discriminator_mlp_forward(x, params)
    out = jax.block_until_ready(out)

    ref = reference_forward(x, params)
    assert out.shape == (batch,), out.shape
    # bf16 matmul inputs + approx EUP reciprocal -> loosened tolerance vs f32 ref.
    assert jnp.allclose(out, ref, atol=1e-2, rtol=1e-2), (out, ref)

    print("KERNEL_OK")
</pallas_src>

<mosaic_0001>
module attributes {stable_mosaic.version = 11 : i64} {
  func.func @discriminator_mlp_kernel(%arg0: i32, %arg1: memref<8x1024xf32, #tpu.memory_space<vmem>>, %arg2: memref<1024x128xbf16, #tpu.memory_space<vmem>>, %arg3: memref<1x128xf32, #tpu.memory_space<vmem>>, %arg4: memref<128x64xbf16, #tpu.memory_space<vmem>>, %arg5: memref<1x64xf32, #tpu.memory_space<vmem>>, %arg6: memref<64x32xbf16, #tpu.memory_space<vmem>>, %arg7: memref<1x32xf32, #tpu.memory_space<vmem>>, %arg8: memref<1x32xf32, #tpu.memory_space<vmem>>, %arg9: memref<1x1xf32, #tpu.memory_space<smem>>, %arg10: memref<8x1xf32, #tpu.memory_space<vmem>>) attributes {dimension_semantics = [#tpu.dimension_semantics<parallel>], iteration_bounds = array<i64: 1>, scalar_prefetch = 0 : i64, scratch_operands = 0 : i64, tpu.core_type = #tpu.core_type<tc>, window_params = [{transform_indices = @transform_0, window_bounds = array<i64: 8, 1024>}, {pipeline_mode = #tpu.pipeline_mode<synchronous>, transform_indices = @transform_1, window_bounds = array<i64: 1024, 128>}, {pipeline_mode = #tpu.pipeline_mode<synchronous>, transform_indices = @transform_2, window_bounds = array<i64: 1, 128>}, {pipeline_mode = #tpu.pipeline_mode<synchronous>, transform_indices = @transform_3, window_bounds = array<i64: 128, 64>}, {pipeline_mode = #tpu.pipeline_mode<synchronous>, transform_indices = @transform_4, window_bounds = array<i64: 1, 64>}, {pipeline_mode = #tpu.pipeline_mode<synchronous>, transform_indices = @transform_5, window_bounds = array<i64: 64, 32>}, {pipeline_mode = #tpu.pipeline_mode<synchronous>, transform_indices = @transform_6, window_bounds = array<i64: 1, 32>}, {pipeline_mode = #tpu.pipeline_mode<synchronous>, transform_indices = @transform_7, window_bounds = array<i64: 1, 32>}, {transform_indices = @transform_8, window_bounds = array<i64: 1, 1>}, {transform_indices = @transform_9, window_bounds = array<i64: 8, 1>}]} {
    %c0 = arith.constant 0 : index
    %c0_0 = arith.constant 0 : index
    %0 = vector.load %arg1[%c0, %c0_0] : memref<8x1024xf32, #tpu.memory_space<vmem>>, vector<8x1024xf32>
    %1 = arith.truncf %0 : vector<8x1024xf32> to vector<8x1024xbf16>
    %c0_1 = arith.constant 0 : index
    %c0_2 = arith.constant 0 : index
    %2 = vector.load %arg2[%c0_1, %c0_2] : memref<1024x128xbf16, #tpu.memory_space<vmem>>, vector<1024x128xbf16>
    %cst = arith.constant dense<0.000000e+00> : vector<8x128xf32>
    %3 = tpu.matmul %1, %2, %cst {dimension_numbers = #tpu.dot_dimension_numbers<[1], [0], [0], [1], [0, 0, 1, 1], [], []>} : vector<8x1024xbf16>, vector<1024x128xbf16>, vector<8x128xf32> -> vector<8x128xf32>
    %c0_3 = arith.constant 0 : index
    %c0_4 = arith.constant 0 : index
    %4 = vector.load %arg3[%c0_3, %c0_4] : memref<1x128xf32, #tpu.memory_space<vmem>>, vector<1x128xf32>
    %5 = vector.broadcast %4 : vector<1x128xf32> to vector<8x128xf32>
    %6 = arith.addf %3, %5 : vector<8x128xf32>
    %cst_5 = arith.constant 2.000000e-01 : f32
    %7 = vector.broadcast %cst_5 : f32 to vector<8x128xf32>
    %8 = arith.mulf %7, %6 : vector<8x128xf32>
    %9 = arith.maximumf %6, %8 : vector<8x128xf32>
    %10 = arith.truncf %9 : vector<8x128xf32> to vector<8x128xbf16>
    %c0_6 = arith.constant 0 : index
    %c0_7 = arith.constant 0 : index
    %11 = vector.load %arg4[%c0_6, %c0_7] : memref<128x64xbf16, #tpu.memory_space<vmem>>, vector<128x64xbf16>
    %cst_8 = arith.constant dense<0.000000e+00> : vector<8x64xf32>
    %12 = tpu.matmul %10, %11, %cst_8 {dimension_numbers = #tpu.dot_dimension_numbers<[1], [0], [0], [1], [0, 0, 1, 1], [], []>} : vector<8x128xbf16>, vector<128x64xbf16>, vector<8x64xf32> -> vector<8x64xf32>
    %c0_9 = arith.constant 0 : index
    %c0_10 = arith.constant 0 : index
    %13 = vector.load %arg5[%c0_9, %c0_10] : memref<1x64xf32, #tpu.memory_space<vmem>>, vector<1x64xf32>
    %14 = vector.broadcast %13 : vector<1x64xf32> to vector<8x64xf32>
    %15 = arith.addf %12, %14 : vector<8x64xf32>
    %cst_11 = arith.constant 2.000000e-01 : f32
    %16 = vector.broadcast %cst_11 : f32 to vector<8x64xf32>
    %17 = arith.mulf %16, %15 : vector<8x64xf32>
    %18 = arith.maximumf %15, %17 : vector<8x64xf32>
    %19 = arith.truncf %18 : vector<8x64xf32> to vector<8x64xbf16>
    %c0_12 = arith.constant 0 : index
    %c0_13 = arith.constant 0 : index
    %20 = vector.load %arg6[%c0_12, %c0_13] : memref<64x32xbf16, #tpu.memory_space<vmem>>, vector<64x32xbf16>
    %cst_14 = arith.constant dense<0.000000e+00> : vector<8x32xf32>
    %21 = tpu.matmul %19, %20, %cst_14 {dimension_numbers = #tpu.dot_dimension_numbers<[1], [0], [0], [1], [0, 0, 1, 1], [], []>} : vector<8x64xbf16>, vector<64x32xbf16>, vector<8x32xf32> -> vector<8x32xf32>
    %c0_15 = arith.constant 0 : index
    %c0_16 = arith.constant 0 : index
    %22 = vector.load %arg7[%c0_15, %c0_16] : memref<1x32xf32, #tpu.memory_space<vmem>>, vector<1x32xf32>
    %23 = vector.broadcast %22 : vector<1x32xf32> to vector<8x32xf32>
    %24 = arith.addf %21, %23 : vector<8x32xf32>
    %cst_17 = arith.constant 2.000000e-01 : f32
    %25 = vector.broadcast %cst_17 : f32 to vector<8x32xf32>
    %26 = arith.mulf %25, %24 : vector<8x32xf32>
    %27 = arith.maximumf %24, %26 : vector<8x32xf32>
    %c0_18 = arith.constant 0 : index
    %c0_19 = arith.constant 0 : index
    %28 = vector.load %arg8[%c0_18, %c0_19] : memref<1x32xf32, #tpu.memory_space<vmem>>, vector<1x32xf32>
    %29 = vector.broadcast %28 : vector<1x32xf32> to vector<8x32xf32>
    %30 = arith.mulf %27, %29 : vector<8x32xf32>
    %cst_20 = arith.constant dense<0.000000e+00> : vector<8xf32>
    %31 = vector.multi_reduction <add>, %30, %cst_20 [1] : vector<8x32xf32> to vector<8xf32>
    %32 = vector.shape_cast %31 : vector<8xf32> to vector<8x1xf32>
    %c0_21 = arith.constant 0 : index
    %c0_22 = arith.constant 0 : index
    %33 = memref.load %arg9[%c0_21, %c0_22] : memref<1x1xf32, #tpu.memory_space<smem>>
    %34 = vector.broadcast %33 : f32 to vector<8x1xf32>
    %35 = arith.addf %32, %34 : vector<8x1xf32>
    %36 = math.absf %35 : vector<8x1xf32>
    %cst_23 = arith.constant 0.000000e+00 : f32
    %37 = vector.broadcast %cst_23 : f32 to vector<8x1xf32>
    %38 = arith.subf %37, %36 : vector<8x1xf32>
    %39 = math.exp %38 : vector<8x1xf32>
    %cst_24 = arith.constant 0.000000e+00 : f32
    %40 = vector.broadcast %cst_24 : f32 to vector<8x1xf32>
    %41 = arith.cmpf oge, %35, %40 : vector<8x1xf32>
    %cst_25 = arith.constant 1.000000e+00 : f32
    %42 = vector.broadcast %cst_25 : f32 to vector<8x1xf32>
    %43 = arith.select %41, %42, %39 : vector<8x1xi1>, vector<8x1xf32>
    %cst_26 = arith.constant 1.000000e+00 : f32
    %44 = vector.broadcast %cst_26 : f32 to vector<8x1xf32>
    %45 = arith.addf %44, %39 : vector<8x1xf32>
    %46 = tpu.reciprocal %45 {approx = true} : vector<8x1xf32> -> vector<8x1xf32>
    %47 = arith.mulf %43, %46 : vector<8x1xf32>
    %c0_27 = arith.constant 0 : index
    %c0_28 = arith.constant 0 : index
    %48 = vector.load %arg10[%c0_27, %c0_28] : memref<8x1xf32, #tpu.memory_space<vmem>>, vector<8x1xf32>
    tpu.vector_store %arg10[%c0_27, %c0_28], %47 {strides = array<i32>} : memref<8x1xf32, #tpu.memory_space<vmem>>, vector<8x1xf32>,
    return
  }
  func.func @transform_0(%arg0: i32) -> (i32, i32) {
    %c0_i32 = arith.constant 0 : i32
    %c0_i32_0 = arith.constant 0 : i32
    return %arg0, %c0_i32 : i32, i32
  }
  func.func @transform_1(%arg0: i32) -> (i32, i32) {
    %c0_i32 = arith.constant 0 : i32
    %c0_i32_0 = arith.constant 0 : i32
    %c0_i32_1 = arith.constant 0 : i32
    return %c0_i32, %c0_i32_0 : i32, i32
  }
  func.func @transform_2(%arg0: i32) -> (i32, i32) {
    %c0_i32 = arith.constant 0 : i32
    %c0_i32_0 = arith.constant 0 : i32
    %c0_i32_1 = arith.constant 0 : i32
    return %c0_i32, %c0_i32_0 : i32, i32
  }
  func.func @transform_3(%arg0: i32) -> (i32, i32) {
    %c0_i32 = arith.constant 0 : i32
    %c0_i32_0 = arith.constant 0 : i32
    %c0_i32_1 = arith.constant 0 : i32
    return %c0_i32, %c0_i32_0 : i32, i32
  }
  func.func @transform_4(%arg0: i32) -> (i32, i32) {
    %c0_i32 = arith.constant 0 : i32
    %c0_i32_0 = arith.constant 0 : i32
    %c0_i32_1 = arith.constant 0 : i32
    return %c0_i32, %c0_i32_0 : i32, i32
  }
  func.func @transform_5(%arg0: i32) -> (i32, i32) {
    %c0_i32 = arith.constant 0 : i32
    %c0_i32_0 = arith.constant 0 : i32
    %c0_i32_1 = arith.constant 0 : i32
    return %c0_i32, %c0_i32_0 : i32, i32
  }
  func.func @transform_6(%arg0: i32) -> (i32, i32) {
    %c0_i32 = arith.constant 0 : i32
    %c0_i32_0 = arith.constant 0 : i32
    %c0_i32_1 = arith.constant 0 : i32
    return %c0_i32, %c0_i32_0 : i32, i32
  }
  func.func @transform_7(%arg0: i32) -> (i32, i32) {
    %c0_i32 = arith.constant 0 : i32
    %c0_i32_0 = arith.constant 0 : i32
    %c0_i32_1 = arith.constant 0 : i32
    return %c0_i32, %c0_i32_0 : i32, i32
  }
  func.func @transform_8(%arg0: i32) -> (i32, i32) {
    %c0_i32 = arith.constant 0 : i32
    %c0_i32_0 = arith.constant 0 : i32
    %c0_i32_1 = arith.constant 0 : i32
    return %c0_i32, %c0_i32_0 : i32, i32
  }
  func.func @transform_9(%arg0: i32) -> (i32, i32) {
    %c0_i32 = arith.constant 0 : i32
    %c0_i32_0 = arith.constant 0 : i32
    return %arg0, %c0_i32 : i32, i32
  }
}

</mosaic_0001>

<bundles_post_ra>
// kernel: tpu_custom_call.1
= control target key start
LH: loop header
LB: loop body
LE: loop exit
PB: predicated region body
PF: predicated region fallthrough
CT: control target
= control target key end

     0   :  { %15 = vsyncpa [#allocation4], 0  ;;  %s1436_s30 = smov [#allocation3]   ;;  %s1606_s0 = inlined_call_operand.vmem [shape: f32[2,1024], index: 0, kind: input, shape index: {}]   ;;  %s1607_s1 = inlined_call_operand.hbm [shape: bf16[1024,128], index: 1, kind: input, shape index: {}]   ;;  %s1608_s2 = inlined_call_operand.vmem [shape: f32[1,128], index: 2, kind: input, shape index: {}]   ;;  %s1609_s3 = inlined_call_operand.vmem [shape: bf16[128,64], index: 3, kind: input, shape index: {}]   ;;  %s1610_s4 = inlined_call_operand.vmem [shape: f32[1,64], index: 4, kind: input, shape index: {}]   ;;  %s1611_s5 = inlined_call_operand.vmem [shape: bf16[64,32], index: 5, kind: input, shape index: {}]   ;;  %s1612_s6 = inlined_call_operand.vmem [shape: f32[1,32], index: 6, kind: input, shape index: {}]   ;;  %s1613_s7 = inlined_call_operand.vmem [shape: f32[1,32], index: 7, kind: input, shape index: {}]   ;;  %s1614_s8 = inlined_call_operand.<no memory space> [shape: f32[1,1], index: 8, kind: input, shape index: {}]   ;;  %s1615_s9 = inlined_call_operand.vmem [shape: f32[2,1], index: 9, kind: output, shape index: {}]  }
   0x1   :  { %s23_s10 = sshll.u32 %s1436_s30, 4  ;;  %s1412_s13 = scalar_lea.hbm %s1607_s1, 8192  ;;  %s24_s10 = int_to_ptr.vmem [resolvable:$true] %s23_s10 }
   0x2   :  { %p1413_p0 = scmp.ne.s32.totalorder %s1607_s1, %s1412_s13  ;;  %p1416_p1 = scmp.lt.u32.totalorder %s1412_s13, %s1607_s1 }
   0x4   :  { %p1418_p2 = pnand %p1416_p1, %p1413_p0 }
   0x6   :  { %1421 = shalt.err (!%p1418_p2)
}
   0x7   :  { %s1422_s18 = scalar_lea.vmem %s24_s10, 8192  ;;  %p1427_p4 = scmp.lt.s32.totalorder %s24_s10, %s24_s10 }
   0x8   :  { %p1423_p3 = scmp.ne.s32.totalorder %s24_s10, %s1422_s18  ;;  %p1428_p5 = scmp.lt.s32.totalorder %s1422_s18, %s1422_s18 }
   0xa   :  { %p1429_p6 = por %p1428_p5, %p1427_p4 }
   0xc   :  { %p1430_p7 = pnand %p1429_p6, %p1423_p3 }
   0xe   :  { %1433 = shalt.err (!%p1430_p7)
}
   0xf   :  { %s1437_s19 = smov 64   ;;  %s1438_s20 = smov 4  }
  0x10   :  { %29 = dma.hbm_to_vmem [thread:$0]  %s1607_s1, 8192, %s24_s10, [#allocation4], %s1437_s19, %s1437_s19, %s1438_s20  }
  0x11   :  { %1434 = dma.done.wait [#allocation4], 8192  }
  0x12   :  { %1435 = vsyncadd [#allocation4], 4294959104  ;;  %v1320_v0 = vld [vmem:[#allocation3 + $0x40] sm:$0xff]   ;;  %v1324_v4 = vld [vmem:[#allocation3 + $0x48] sm:$0xff]   ;;  %v1439_v24 = vmov 1983009808   ;;  %v71_v26 = vlaneseq }
  0x13   :  { %v1321_v1 = vld [vmem:[#allocation3 + $0xc0] sm:$0xff]   ;;  %1180 = vmatprep.subr.bf16.mxu0 %v1320_v0  ;;  %v1325_v5 = vld [vmem:[#allocation3 + $0xc8] sm:$0xff]   ;;  %v1328_v8 = vld [vmem:[#allocation3 + $0x50] sm:$0xff]   ;;  %v69_v25 = vunpack.c.l.s4 %v1439_v24  ;;  %vm1441_vm0 = vmmov 0   ;;  %vm987_vm1 = vcmask 523264   ;;  %vm1041_vm2 = vcmask 261120  }
  0x14   :  { %v1322_v2 = vld [vmem:[#allocation3] sm:$0xff]   ;;  %1202 = vmatprep.subr.bf16.mxu1 %v1321_v1  ;;  %v1326_v6 = vld [vmem:[#allocation3 + $0x8] sm:$0xff]   ;;  %v1329_v9 = vld [vmem:[#allocation3 + $0xd0] sm:$0xff]   ;;  %v72_v32 = vshrl.u32 %v71_v26, 7  ;;  %vm1057_vm4 = vcmask 7168  }
  0x15   :  { %v1323_v3 = vld [vmem:[#allocation3 + $0x80] sm:$0xff]   ;;  %1181 = vmatpush3.bf16.msra.mxu0 %v1322_v2  ;;  %v1327_v7 = vld [vmem:[#allocation3 + $0x88] sm:$0xff]   ;;  %v1330_v10 = vld [vmem:[#allocation3 + $0x10] sm:$0xff]   ;;  %v70_v31 = vunpack.c.0.s8 %v69_v25 }
  0x16   :  { %1203 = vmatpush3.bf16.msra.mxu1 %v1323_v3  ;;  %1182 = vmatprep.subr.bf16.mxu0 %v1324_v4  ;;  %v1331_v11 = vld [vmem:[#allocation3 + $0x90] sm:$0xff]   ;;  %v1332_v12 = vld [vmem:[#allocation3 + $0x58] sm:$0xff]   ;;  %v1336_v16 = vld [vmem:[#allocation3 + $0x60] sm:$0xff]  }
  0x17   :  { %1204 = vmatprep.subr.bf16.mxu1 %v1325_v5  ;;  %v1333_v13 = vld [vmem:[#allocation3 + $0xd8] sm:$0xff]   ;;  %v1337_v17 = vld [vmem:[#allocation3 + $0xe0] sm:$0xff]   ;;  %v1340_v20 = vld [vmem:[#allocation3 + $0x68] sm:$0xff]   ;;  %v1504_v37 = vsub.s32 %v70_v31, %v72_v32 }
  0x18   :  { %v1334_v14 = vld [vmem:[#allocation3 + $0x18] sm:$0xff]   ;;  %v1338_v18 = vld [vmem:[#allocation3 + $0x20] sm:$0xff]   ;;  %v1341_v21 = vld [vmem:[#allocation3 + $0xe8] sm:$0xff]  }
  0x19   :  { %1183 = vmatpush3.bf16.msra.mxu0 %v1326_v6  ;;  %v1335_v15 = vld [vmem:[#allocation3 + $0x98] sm:$0xff]   ;;  %v1339_v19 = vld [vmem:[#allocation3 + $0xa0] sm:$0xff]   ;;  %v1342_v22 = vld [vmem:[#allocation3 + $0x28] sm:$0xff]  }
  0x1a   :  { %1205 = vmatpush3.bf16.msra.mxu1 %v1327_v7  ;;  %1184 = vmatprep.subr.bf16.mxu0 %v1328_v8  ;;  %v1343_v23 = vld [vmem:[#allocation3 + $0xa8] sm:$0xff]   ;;  %v1344_v27 = vld [vmem:[#allocation3 + $0x70] sm:$0xff]   ;;  %v1348_v33 = vld [vmem:[#allocation3 + $0x78] sm:$0xff]  }
  0x1b   :  { %1206 = vmatprep.subr.bf16.mxu1 %v1329_v9  ;;  %v1345_v28 = vld [vmem:[#allocation3 + $0xf0] sm:$0xff]   ;;  %v1349_v34 = vld [vmem:[#allocation3 + $0xf8] sm:$0xff]   ;;  %v1358_v44 = vld [vmem:[#allocation3 + $0x140] sm:$0xff]  }
  0x1c   :  { %v1346_v29 = vld [vmem:[#allocation3 + $0x30] sm:$0xff]   ;;  %v1350_v35 = vld [vmem:[#allocation3 + $0x38] sm:$0xff]   ;;  %v1359_v47 = vld [vmem:[#allocation3 + $0x1c0] sm:$0xff]  }
  0x1d   :  { %1185 = vmatpush3.bf16.msra.mxu0 %v1330_v10  ;;  %v1347_v30 = vld [vmem:[#allocation3 + $0xb0] sm:$0xff]   ;;  %v1351_v36 = vld [vmem:[#allocation3 + $0xb8] sm:$0xff]   ;;  %v1360_v50 = vld [vmem:[#allocation3 + $0x100] sm:$0xff]  }
  0x1e   :  { %1207 = vmatpush3.bf16.msra.mxu1 %v1331_v11  ;;  %1186 = vmatprep.subr.bf16.mxu0 %v1332_v12  ;;  %v1352_v38 = vld [vmem:[%s1606_s0] ss:$16 sps:$4 sm:$0xff]   ;;  %v1356_v40 = vld [vmem:[%s1606_s0 + $0x4] ss:$16 sps:$4 sm:$0xff]   ;;  %v1362_v56 = vld [vmem:[#allocation3 + $0x148] sm:$0xff]  }
  0x1f   :  { %1208 = vmatprep.subr.bf16.mxu1 %v1333_v13  ;;  %v1354_v39 = vld [vmem:[%s1606_s0 + $0x20] ss:$16 sps:$4 sm:$0xff]   ;;  %v1357_v41 = vld [vmem:[%s1606_s0 + $0x24] ss:$16 sps:$4 sm:$0xff]   ;;  %v74_v42 = vrot.slane %v1352_v38, %v1504_v37  ;;  %v81_v45 = vrot.slane %v1356_v40, %v1504_v37  ;;  %v1363_v59 = vld [vmem:[#allocation3 + $0x1c8] sm:$0xff]   ;;  %v1440_v40 = vmov 0.0  }
  0x20   :  { %v88_v43 = vrot.slane %v1354_v39, %v1504_v37  ;;  %v95_v46 = vrot.slane %v1357_v41, %v1504_v37  ;;  %v1361_v53 = vld [vmem:[#allocation3 + $0x180] sm:$0xff]   ;;  %v1364_v60 = vld [vmem:[#allocation3 + $0x108] sm:$0xff]   ;;  %v1366_v62 = vld [vmem:[#allocation3 + $0x150] sm:$0xff]  }
  0x21   :  { %1187 = vmatpush3.bf16.msra.mxu0 %v1334_v14  ;;  %v1365_v61 = vld [vmem:[#allocation3 + $0x188] sm:$0xff]   ;;  %v1367_v63 = vld [vmem:[#allocation3 + $0x1d0] sm:$0xff]   ;;  %v1370_v2 = vld [vmem:[#allocation3 + $0x158] sm:$0xff]  }
  0x22   :  { %1209 = vmatpush3.bf16.msra.mxu1 %v1335_v15  ;;  %1188 = vmatprep.subr.bf16.mxu0 %v1336_v16  ;;  %v97_v48 = vcombine.high %v74_v42, %v88_v43  ;;  %v96_v49 = vcombine.low %v74_v42, %v88_v43  ;;  %v99_v51 = vcombine.high %v81_v45, %v95_v46  ;;  %v1368_v0 = vld [vmem:[#allocation3 + $0x110] sm:$0xff]   ;;  %v1371_v3 = vld [vmem:[#allocation3 + $0x1d8] sm:$0xff]   ;;  %v1374_v6 = vld [vmem:[#allocation3 + $0x160] sm:$0xff]  }
  0x23   :  { %1210 = vmatprep.subr.bf16.mxu1 %v1337_v17  ;;  %v98_v52 = vcombine.low %v81_v45, %v95_v46  ;;  %v1369_v1 = vld [vmem:[#allocation3 + $0x190] sm:$0xff]   ;;  %v1372_v4 = vld [vmem:[#allocation3 + $0x118] sm:$0xff]   ;;  %v1375_v7 = vld [vmem:[#allocation3 + $0x1e0] sm:$0xff]  }
  0x24   :  { %v145_v54 = vpack.c.bf16 %v97_v48, %v97_v48  ;;  %v144_v55 = vpack.c.bf16 %v96_v49, %v96_v49  ;;  %v147_v57 = vpack.c.bf16 %v99_v51, %v99_v51  ;;  %v1373_v5 = vld [vmem:[#allocation3 + $0x198] sm:$0xff]   ;;  %v1376_v8 = vld [vmem:[#allocation3 + $0x120] sm:$0xff]   ;;  %v1378_v10 = vld [vmem:[#allocation3 + $0x168] sm:$0xff]  }
  0x25   :  { %1189 = vmatpush3.bf16.msra.mxu0 %v1338_v18  ;;  %v146_v58 = vpack.c.bf16 %v98_v52, %v98_v52  ;;  %v1377_v9 = vld [vmem:[#allocation3 + $0x1a0] sm:$0xff]   ;;  %v1379_v11 = vld [vmem:[#allocation3 + $0x1e8] sm:$0xff]   ;;  %v1382_v14 = vld [vmem:[#allocation3 + $0x170] sm:$0xff]  }
  0x26   :  { %1211 = vmatpush3.bf16.msra.mxu1 %v1339_v19  ;;  %1190 = vmatprep.subr.bf16.mxu0 %v1340_v20  ;;  %v1380_v12 = vld [vmem:[#allocation3 + $0x128] sm:$0xff]   ;;  %v1383_v15 = vld [vmem:[#allocation3 + $0x1f0] sm:$0xff]   ;;  %v1386_v18 = vld [vmem:[#allocation3 + $0x178] sm:$0xff]  }
  0x27   :  { %1212 = vmatprep.subr.bf16.mxu1 %v1341_v21  ;;  %703 = vmatprep.mubr.bf16.mxu0 %v145_v54  ;;  %v1381_v13 = vld [vmem:[#allocation3 + $0x1a8] sm:$0xff]   ;;  %v1384_v16 = vld [vmem:[#allocation3 + $0x130] sm:$0xff]   ;;  %v1387_v19 = vld [vmem:[#allocation3 + $0x1f8] sm:$0xff]  }
  0x28   :  { %743 = vmatprep.mubr.bf16.mxu1 %v147_v57  ;;  %v1385_v17 = vld [vmem:[#allocation3 + $0x1b0] sm:$0xff]   ;;  %v1388_v20 = vld [vmem:[#allocation3 + $0x138] sm:$0xff]   ;;  %v1396_v39 = vld [vmem:[%s1609_s3] sm:$0xff]  }
  0x29   :  { %1191 = vmatpush3.bf16.msra.mxu0 %v1342_v22  ;;  %v1389_v21 = vld [vmem:[#allocation3 + $0x1b8] sm:$0xff]   ;;  %v1398_v41 = vld [vmem:[%s1609_s3 + $0x10] sm:$0xff]   ;;  %v1400_v43 = vld [vmem:[%s1609_s3 + $0x20] sm:$0xff]  }
  0x2a   :  { %1213 = vmatpush3.bf16.msra.mxu1 %v1343_v23  ;;  %1192 = vmatprep.subr.bf16.mxu0 %v1344_v27  ;;  %v1390_v22 = vld [vmem:[%s1606_s0 + $0x8] ss:$16 sps:$4 sm:$0xff]   ;;  %v1394_v24 = vld [vmem:[%s1606_s0 + $0xc] ss:$16 sps:$4 sm:$0xff]   ;;  %v1402_v45 = vld [vmem:[%s1609_s3 + $0x30] sm:$0xff]  }
  0x2b   :  { %1214 = vmatprep.subr.bf16.mxu1 %v1345_v28  ;;  %v1392_v23 = vld [vmem:[%s1606_s0 + $0x28] ss:$16 sps:$4 sm:$0xff]   ;;  %v1395_v25 = vld [vmem:[%s1606_s0 + $0x2c] ss:$16 sps:$4 sm:$0xff]   ;;  %v110_v26 = vrot.slane %v1390_v22, %v1504_v37  ;;  %v117_v28 = vrot.slane %v1394_v24, %v1504_v37  ;;  %v1099_v51 = vld [vmem:[%s1608_s2] ss:$0 sm:$0xff] }
  0x2c   :  { %v124_v27 = vrot.slane %v1392_v23, %v1504_v37  ;;  %v1399_v42 = vld [vmem:[%s1609_s3 + $0x18] sm:$0xff]   ;;  %v1405_v48 = vld [vmem:[%s1611_s5 + $0x8] sm:$0xff]   ;;  %v1173_v24 = vld [vmem:[%s1612_s6] ss:$0 sm:$0xff] }
  0x2d   :  { %1193 = vmatpush3.bf16.msra.mxu0 %v1346_v29  ;;  %v131_v29 = vrot.slane %v1395_v25, %v1504_v37  ;;  %v1397_v37 = vld [vmem:[%s1609_s3 + $0x8] sm:$0xff]   ;;  %v1403_v46 = vld [vmem:[%s1609_s3 + $0x38] sm:$0xff]  }
  0x2e   :  { %1215 = vmatpush3.bf16.msra.mxu1 %v1347_v30  ;;  %1194 = vmatprep.subr.bf16.mxu0 %v1348_v33  ;;  %v133_v30 = vcombine.high %v110_v26, %v124_v27  ;;  %v132_v31 = vcombine.low %v110_v26, %v124_v27 }
  0x2f   :  { %1216 = vmatprep.subr.bf16.mxu1 %v1349_v34  ;;  %v135_v32 = vcombine.high %v117_v28, %v131_v29  ;;  %v134_v33 = vcombine.low %v117_v28, %v131_v29 }
  0x30   :  { %v149_v34 = vpack.c.bf16 %v133_v30, %v133_v30 }
  0x31   :  { %1195 = vmatpush3.bf16.msra.mxu0 %v1350_v35  ;;  %v148_v35 = vpack.c.bf16 %v132_v31, %v132_v31  ;;  %v150_v38 = vpack.c.bf16 %v134_v33, %v134_v33  ;;  %v1179_v31 = vld [vmem:[%s1613_s7] ss:$0 sm:$0xff] }
  0x32   :  { %1217 = vmatpush3.bf16.msra.mxu1 %v1351_v36  ;;  %1224 = vmatprep.subr.bf16.mxu0 %v1358_v44  ;;  %v151_v36 = vpack.c.bf16 %v135_v32, %v135_v32  ;;  %v1401_v44 = vld [vmem:[%s1609_s3 + $0x28] sm:$0xff]  }
  0x33   :  { %1246 = vmatprep.subr.bf16.mxu1 %v1359_v47  ;;  %v1404_v47 = vld [vmem:[%s1611_s5] sm:$0xff]  }
  0x34   :  { %704 = vmatmul.mubr.bf16.vlgmr.msra.gmra.mrb[0].mxu0 %v144_v55 }
  0x35   :  { %744 = vmatmul.mubr.bf16.vlgmr.msra.gmra.mrb[0].mxu1 %v146_v58  ;;  %1225 = vmatpush3.bf16.msra.mxu0 %v1360_v50 }
  0x36   :  { %1247 = vmatpush3.bf16.msra.mxu1 %v1361_v53  ;;  %1226 = vmatprep.subr.bf16.mxu0 %v1362_v56 }
  0x37   :  { %1248 = vmatprep.subr.bf16.mxu1 %v1363_v59  ;;  %783 = vmatprep.mubr.bf16.mxu0 %v149_v34 }
  0x38   :  { %823 = vmatprep.mubr.bf16.mxu1 %v151_v36 }
  0x39   :  { %1227 = vmatpush3.bf16.msra.mxu0 %v1364_v60 }
  0x3a   :  { %1249 = vmatpush3.bf16.msra.mxu1 %v1365_v61  ;;  %1228 = vmatprep.subr.bf16.mxu0 %v1366_v62 }
  0x3b   :  { %1250 = vmatprep.subr.bf16.mxu1 %v1367_v63 }
  0x3d   :  { %1229 = vmatpush3.bf16.msra.mxu0 %v1368_v0 }
  0x3e   :  { %1251 = vmatpush3.bf16.msra.mxu1 %v1369_v1  ;;  %1230 = vmatprep.subr.bf16.mxu0 %v1370_v2 }
  0x3f   :  { %1252 = vmatprep.subr.bf16.mxu1 %v1371_v3 }
  0x41   :  { %1231 = vmatpush3.bf16.msra.mxu0 %v1372_v4 }
  0x42   :  { %1253 = vmatpush3.bf16.msra.mxu1 %v1373_v5  ;;  %1232 = vmatprep.subr.bf16.mxu0 %v1374_v6 }
  0x43   :  { %1254 = vmatprep.subr.bf16.mxu1 %v1375_v7 }
  0x45   :  { %1233 = vmatpush3.bf16.msra.mxu0 %v1376_v8 }
  0x46   :  { %1255 = vmatpush3.bf16.msra.mxu1 %v1377_v9  ;;  %1234 = vmatprep.subr.bf16.mxu0 %v1378_v10 }
  0x47   :  { %1256 = vmatprep.subr.bf16.mxu1 %v1379_v11 }
  0x49   :  { %1235 = vmatpush3.bf16.msra.mxu0 %v1380_v12 }
  0x4a   :  { %1257 = vmatpush3.bf16.msra.mxu1 %v1381_v13  ;;  %1236 = vmatprep.subr.bf16.mxu0 %v1382_v14  ;;  %v1406_v13 = vld [vmem:[%s1611_s5 + $0x10] sm:$0xff]   ;;  %v1407_v14 = vld [vmem:[%s1611_s5 + $0x18] sm:$0xff]  }
  0x4b   :  { %1258 = vmatprep.subr.bf16.mxu1 %v1383_v15  ;;  %v1164_v15 = vld [vmem:[%s1610_s4] ss:$0 sm:$0xff] }
  0x4d   :  { %1237 = vmatpush3.bf16.msra.mxu0 %v1384_v16 }
  0x4e   :  { %1259 = vmatpush3.bf16.msra.mxu1 %v1385_v17  ;;  %1238 = vmatprep.subr.bf16.mxu0 %v1386_v18 }
  0x4f   :  { %1260 = vmatprep.subr.bf16.mxu1 %v1387_v19 }
  0x51   :  { %1239 = vmatpush3.bf16.msra.mxu0 %v1388_v20 }
  0x52   :  { %1261 = vmatpush3.bf16.msra.mxu1 %v1389_v21  ;;  %1282 = vmatprep.subr.bf16.mxu0 %v1440_v40 }
  0x53   :  { %1302 = vmatprep.subr.bf16.mxu1 %v1440_v40 }
  0x54   :  { %784 = vmatmul.mubr.bf16.vlgmr.msra.gmra.mrb[4].mxu0 %v148_v35  ;;  %v1046_v35 = vstv %s1614_s8 }
  0x55   :  { %824 = vmatmul.mubr.bf16.vlgmr.msra.gmra.mrb[4].mxu1 %v150_v38  ;;  %1283 = vmatpush3.bf16.msra.mxu0 %v1396_v39 }
  0x56   :  { %1284 = vmatprep.subr.bf16.mxu0 %v1440_v40  ;;  %1298 = vmatprep.mubr.msk.bf16.mxu0 %vm1441_vm0, %v1440_v40 }
  0x57   :  { %1310 = vmatprep.mubr.msk.bf16.mxu1 %vm1441_vm0, %v1440_v40  ;;  %1303 = vmatpush3.bf16.msra.mxu1 %v1404_v47 }
  0x58   :  { %1304 = vmatprep.subr.bf16.mxu1 %v1440_v40 }
  0x59   :  { %1285 = vmatpush3.bf16.msra.mxu0 %v1397_v37 }
  0x5a   :  { %1286 = vmatprep.subr.bf16.mxu0 %v1440_v40 }
  0x5b   :  { %1305 = vmatpush3.bf16.msra.mxu1 %v1405_v48 }
  0x5c   :  { %1306 = vmatprep.subr.bf16.mxu1 %v1440_v40 }
  0x5d   :  { %1287 = vmatpush3.bf16.msra.mxu0 %v1398_v41 }
  0x5e   :  { %1288 = vmatprep.subr.bf16.mxu0 %v1440_v40 }
  0x5f   :  { %1307 = vmatpush3.bf16.msra.mxu1 %v1406_v13 }
  0x60   :  { %1308 = vmatprep.subr.bf16.mxu1 %v1440_v40 }
  0x61   :  { %1289 = vmatpush3.bf16.msra.mxu0 %v1399_v42 }
  0x62   :  { %1290 = vmatprep.subr.bf16.mxu0 %v1440_v40 }
  0x63   :  { %1309 = vmatpush3.bf16.msra.mxu1 %v1407_v14 }
  0x65   :  { %1291 = vmatpush3.bf16.msra.mxu0 %v1400_v43 }
  0x66   :  { %1292 = vmatprep.subr.bf16.mxu0 %v1440_v40 }
  0x69   :  { %1293 = vmatpush3.bf16.msra.mxu0 %v1401_v44 }
  0x6a   :  { %1294 = vmatprep.subr.bf16.mxu0 %v1440_v40 }
  0x6d   :  { %1295 = vmatpush3.bf16.msra.mxu0 %v1402_v45 }
  0x6e   :  { %1296 = vmatprep.subr.bf16.mxu0 %v1440_v40 }
  0x71   :  { %1297 = vmatpush3.bf16.msra.mxu0 %v1403_v46 }
 0x107   :  { %v1196_v49 = vpop.f32.mrb[0].mxu0 }
 0x108   :  { %v1218_v50 = vpop.f32.mrb[0].mxu1  ;;  %v1197_v52 = vpop.f32.mrb[1].mxu0 }
 0x109   :  { %v1198_v53 = vadd.f32 %v1197_v52, %v1196_v49  ;;  %v1219_v54 = vpop.f32.mrb[1].mxu1  ;;  %v1199_v55 = vpop.f32.mrb[2].mxu0 }
 0x10a   :  { %v1220_v56 = vadd.f32 %v1219_v54, %v1218_v50  ;;  %v1221_v57 = vpop.f32.mrb[2].mxu1  ;;  %v1200_v58 = vpop.f32.mrb[3].mxu0 }
 0x10b   :  { %v706_v59 = vadd.f32 %v1198_v53, %v1099_v51  ;;  %v1222_v60 = vpop.f32.mrb[3].mxu1 }
 0x10d   :  { %v746_v61 = vadd.f32 %v1220_v56, %v706_v59 }
 0x127   :  { %v1240_v62 = vpop.f32.mrb[4].mxu0 }
 0x128   :  { %v1262_v63 = vpop.f32.mrb[4].mxu1  ;;  %v1241_v0 = vpop.f32.mrb[5].mxu0 }
 0x129   :  { %v1242_v1 = vadd.f32 %v1241_v0, %v1240_v62  ;;  %v1263_v2 = vpop.f32.mrb[5].mxu1  ;;  %v1243_v3 = vpop.f32.mrb[6].mxu0 }
 0x12a   :  { %v1264_v4 = vadd.f32 %v1263_v2, %v1262_v63  ;;  %v1265_v5 = vpop.f32.mrb[6].mxu1  ;;  %v1244_v6 = vpop.f32.mrb[7].mxu0 }
 0x12b   :  { %v786_v7 = vadd.f32 %v1242_v1, %v746_v61  ;;  %v1266_v8 = vpop.f32.mrb[7].mxu1 }
 0x12d   :  { %v826_v9 = vadd.f32 %v1264_v4, %v786_v7 }
 0x12f   :  { %v831_v10 = vmul.f32 0.2, %v826_v9 }
 0x131   :  { %v832_v11 = vmax.f32 %v826_v9, %v831_v10 }
 0x133   :  { %v833_v12 = vpack.c.bf16 %v832_v11, %v832_v11 }
 0x135   :  { %1299 = vmatmul.mubr.bf16.vlgmr.msra.gmra.mrb[8].mxu0 %v833_v12 }
 0x208   :  { %v939_v16 = vpop.f32.mrb[8].mxu0 }
 0x209   :  { %v940_v17 = vadd.f32 %v1164_v15, %v939_v16  ;;  %v1300_v18 = vpop.f32.mrb[9].mxu0 }
 0x20a   :  { %v942_v19 = vpop.f32.mrb[10].mxu0 }
 0x20b   :  { %v945_v20 = vmul.f32 0.2, %v940_v17  ;;  %v1301_v21 = vpop.f32.mrb[11].mxu0 }
 0x20d   :  { %v946_v22 = vmax.f32 %v940_v17, %v945_v20 }
 0x20f   :  { %v947_v23 = vpack.c.bf16 %v946_v22, %v946_v22 }
 0x211   :  { %1311 = vmatmul.mubr.msk.bf16.vlgmr.msra.gmra.mrb[8].mxu1 %vm987_vm1, %v947_v23 }
 0x2e4   :  { %v1025_v25 = vpop.f32.mrb[8].mxu1 }
 0x2e5   :  { %v1026_v26 = vadd.f32 %v1173_v24, %v1025_v25  ;;  %v1312_v27 = vpop.f32.mrb[9].mxu1 }
 0x2e6   :  { %v1028_v28 = vpop.f32.mrb[10].mxu1 }
 0x2e7   :  { %v1031_v29 = vmul.f32 0.2, %v1026_v26  ;;  %v1313_v30 = vpop.f32.mrb[11].mxu1 }
 0x2e9   :  { %v1032_v32 = vmax.f32 %v1026_v26, %v1031_v29 }
 0x2eb   :  { %v1040_v33 = vmul.f32 %v1179_v31, %v1032_v32 }
 0x2ed   :  { %v1042_v34 = vsel %vm1041_vm2, %v1040_v33, 0.0 }
 0x2ee   :  { %1043 = vadd.xlane.f32.xlu0 %v1042_v34 }
 0x37b   :  { %v1044_v36 = vpop.xlane.xlu0 %1043 }
 0x37c   :  { %v1047_v38 = vadd.f32 %v1046_v35, %v1044_v36 }
 0x37e   :  { %v1048_v39 = vand.u32 2147483647, %v1047_v38  ;;  %vm1052_vm3 = vcmp.ge.f32.partialorder %v1047_v38, 0.0 }
 0x380   :  { %v1049_v40 = vsub.f32 0.0, %v1048_v39 }
 0x382   :  { %v1050_v37 = vmul.f32 1.442695, %v1049_v40 }
 0x384   :  { %1408 = vpow2.f32 %v1050_v37 }
 0x38e   :  { %v1409_v41 = vpop.eup %1408 }
 0x38f   :  { %v1054_v42 = vadd.f32 1.0, %v1409_v41  ;;  %v1053_v44 = vsel %vm1052_vm3, 1.0, %v1409_v41 }
 0x391   :  { %1410 = vrcp.f32 %v1054_v42 }
 0x39b   :  { %v1411_v43 = vpop.eup %1410 }
 0x39c   :  { %v1056_v45 = vmul.f32 %v1411_v43, %v1053_v44 }
 0x39e   :  { %1058 = vst.msk [vmem:[#allocation5] sm:$0xff] %vm1057_vm4, %v1056_v45 }
 0x3a5   :  { %v1076_v46 = vld [vmem:[#allocation5] sm:$0x3] }
 0x3a6   :  { %1077 = vst [vmem:[%s1615_s9] sm:$0x3] %v1076_v46 }
 0x3a7   :  { %1094 = vsyncpa [#allocation4], 1 }

</bundles_post_ra>
